<compile_context>
chip_gen: v5e
topology: v5e:2x2
jax: 0.10.0
libtpu: 0.0.40
codegen_flags: <defaults>
</compile_context>

<pallas_src>
import functools

import jax
import jax.numpy as jnp
from jax import lax
from jax.experimental import pallas as pl
from jax.experimental.pallas import tpu as pltpu


def _context_block_kernel(x_ref, p_ref, o_ref, *, C, Cb, eps):
    """One batch-tile (bb elements) per grid step.

    x_ref : (bb, C, HW)   input; channels on sublanes, spatial on lanes
    p_ref : (C+4, 2+2*Cb) packed f32 parameter slab:
              rows 0..C-1 : col 0 = conv_mask weight, col 1 = second conv bias,
                            cols 2..2+Cb-1 = W1^T, cols 2+Cb..2+2Cb-1 = W2
              row  C      : b1 (first conv bias)      in cols 0..Cb-1
              row  C+1    : LayerNorm gamma           in cols 0..Cb-1
              row  C+2    : LayerNorm beta            in cols 0..Cb-1
              row  C+3    : PReLU slope               in col 0
    o_ref : (bb, C, HW)   output (same dtype as caller's x)
    """
    xf = x_ref[...].astype(jnp.float32)                       # (bb, C, HW) f32 compute

    P = p_ref[...]                                            # tiny, load once
    wm = P[0:C, 0:1]                                          # (C, 1)  conv_mask weight
    b2 = P[0:C, 1:2]                                          # (C, 1)  second conv bias
    w1t = P[0:C, 2:2 + Cb]                                    # (C, Cb) first conv W^T
    w2 = P[0:C, 2 + Cb:2 + 2 * Cb]                            # (C, Cb) second conv W
    b1 = P[C:C + 1, 0:Cb]                                     # (1, Cb) first conv bias
    g = P[C + 1:C + 2, 0:Cb]                                  # (1, Cb) LN gamma
    be = P[C + 2:C + 3, 0:Cb]                                 # (1, Cb) LN beta
    a = P[C + 3:C + 4, 0:1]                                   # (1, 1)  PReLU slope

    # ---- spatial attention pooling ('att') --------------------------------
    # conv_mask bias omitted: a constant shift cancels in the softmax.
    logits = jnp.sum(xf * wm[None, :, :], axis=1, keepdims=True)    # (bb, 1, HW)
    m = jnp.max(logits, axis=-1, keepdims=True)                     # (bb, 1, 1)
    e = jnp.exp(logits - m)                                         # (bb, 1, HW)
    denom = jnp.sum(e, axis=-1, keepdims=True)                      # (bb, 1, 1)
    # Deferred normalization: scale the C-length context instead of the HW lanes.
    ctx = jnp.sum(xf * e, axis=2, keepdims=True) / denom            # (bb, C, 1)

    # ---- channel_add MLP: 1x1 conv -> LayerNorm -> PReLU -> 1x1 conv ------
    h = jnp.sum(w1t[None, :, :] * ctx, axis=1, keepdims=True) + b1[None, :, :]  # (bb,1,Cb)
    mu = jnp.mean(h, axis=-1, keepdims=True)
    var = jnp.mean((h - mu) * (h - mu), axis=-1, keepdims=True)
    hn = (h - mu) * lax.rsqrt(var + eps) * g[None, :, :] + be[None, :, :]
    hp = jnp.maximum(hn, 0.0) + a[None, :, :] * jnp.minimum(hn, 0.0)            # PReLU
    add = jnp.sum(w2[None, :, :] * hp, axis=2, keepdims=True) + b2[None, :, :]  # (bb,C,1)

    # ---- fuse: out = x + channel_add_term (broadcast over spatial) --------
    o_ref[...] = (xf + add).astype(o_ref.dtype)


def _pick_bb(B, C, HW, itemsize):
    """Pick batch-tile size: largest divisor of B that fits the VMEM budget,
    preferring >= 2 grid steps when B >= 2 (so both v7x TensorCores get work
    on the 'parallel' batch axis) while keeping the step count minimal."""
    c_pad = ((C + 7) // 8) * 8                      # sublane padding of C
    per_b = 4 * c_pad * HW * max(itemsize, 4)       # x + out, double-buffered, f32 copies
    budget = 24 << 20                               # headroom under 32 MiB scoped VMEM
    cap = max(1, budget // per_b)
    divisors = [d for d in range(1, B + 1) if B % d == 0 and d <= cap]
    multi = [d for d in divisors if B // d >= 2]
    return max(multi) if multi else max(divisors)


def context_block_2d(x_nchw, wm, bm, w1, b1, ln_g, ln_b, prelu_a, w2, b2, *, eps=1e-5):
    """ContextBlock2d forward (pool='att', fusions=['channel_add'])."""
    B, C, H, W = x_nchw.shape
    Cb = w1.shape[0]
    HW = H * W
    x = x_nchw.reshape(B, C, HW)                    # keep caller dtype; no host-side cast

    # Pack every tiny parameter into one f32 slab -> a single loop-invariant stream.
    # (conv_mask bias `bm` is intentionally dropped: it cancels in the softmax.)
    PW = 2 + 2 * Cb
    p = jnp.zeros((C + 4, PW), jnp.float32)
    p = p.at[0:C, 0].set(wm.reshape(C).astype(jnp.float32))
    p = p.at[0:C, 1].set(b2.reshape(C).astype(jnp.float32))
    p = p.at[0:C, 2:2 + Cb].set(jnp.transpose(w1.reshape(Cb, C)).astype(jnp.float32))
    p = p.at[0:C, 2 + Cb:2 + 2 * Cb].set(w2.reshape(C, Cb).astype(jnp.float32))
    p = p.at[C, 0:Cb].set(b1.reshape(Cb).astype(jnp.float32))
    p = p.at[C + 1, 0:Cb].set(ln_g.reshape(Cb).astype(jnp.float32))
    p = p.at[C + 2, 0:Cb].set(ln_b.reshape(Cb).astype(jnp.float32))
    p = p.at[C + 3, 0].set(prelu_a.reshape(()).astype(jnp.float32))

    bb = _pick_bb(B, C, HW, x.dtype.itemsize)
    grid = (B // bb,)

    kernel = functools.partial(_context_block_kernel, C=C, Cb=Cb, eps=eps)

    # TODO(synk): on v7x, pltpu.CORE_PARALLEL on the batch axis (or pl.core_map)
    # gives explicit 2-TensorCore sharding; "parallel" kept here for portability.
    out = pl.pallas_call(
        kernel,
        out_shape=jax.ShapeDtypeStruct((B, C, HW), x.dtype),
        grid_spec=pltpu.PrefetchScalarGridSpec(
            num_scalar_prefetch=0,
            grid=grid,
            in_specs=[
                pl.BlockSpec((bb, C, HW), lambda b: (b, 0, 0)),    # x (lane-dense)
                pl.BlockSpec((C + 4, PW), lambda b: (0, 0)),       # packed params
            ],
            out_specs=pl.BlockSpec((bb, C, HW), lambda b: (b, 0, 0)),
        ),
        compiler_params=pltpu.CompilerParams(
            dimension_semantics=("parallel",)),
    )(x, p)

    return out.reshape(B, C, H, W)


def _reference(x, wm, bm, w1, b1, ln_g, ln_b, prelu_a, w2, b2, eps=1e-5):
    """Pure-JAX reference matching the PyTorch ContextBlock2d forward."""
    B, C, H, W = x.shape
    Cb = w1.shape[0]
    xf = x.reshape(B, C, H * W).astype(jnp.float32)
    logits = jnp.einsum('bcn,c->bn', xf, wm.reshape(C)) + bm.reshape(())
    p = jax.nn.softmax(logits, axis=-1)
    ctx = jnp.einsum('bcn,bn->bc', xf, p)                         # (B, C)
    h = ctx @ w1.reshape(Cb, C).T + b1                            # (B, Cb)
    mu = h.mean(-1, keepdims=True)
    var = ((h - mu) ** 2).mean(-1, keepdims=True)
    hn = (h - mu) / jnp.sqrt(var + eps) * ln_g.reshape(Cb) + ln_b.reshape(Cb)
    hp = jnp.where(hn >= 0, hn, prelu_a.reshape(()) * hn)
    add = hp @ w2.reshape(C, Cb).T + b2                           # (B, C)
    return (xf.reshape(B, C, H, W) + add[:, :, None, None]).astype(x.dtype)


if __name__ == "__main__":
    key = jax.random.PRNGKey(0)
    ks = jax.random.split(key, 9)

    # Module defaults: inplanes=9, planes=32, ratio=4 -> bottleneck Cb=8.
    B, C, Cb, H, W = 2, 9, 8, 16, 16

    x = jax.random.normal(ks[0], (B, C, H, W), jnp.float32)
    wm = jax.random.normal(ks[1], (1, C, 1, 1), jnp.float32) * 0.1   # conv_mask weight
    bm = jax.random.normal(ks[2], (1,), jnp.float32) * 0.1           # conv_mask bias
    w1 = jax.random.normal(ks[3], (Cb, C, 1, 1), jnp.float32) * 0.1  # 1x1 conv C->Cb
    b1 = jax.random.normal(ks[4], (Cb,), jnp.float32) * 0.1
    ln_g = 1.0 + jax.random.normal(ks[5], (Cb, 1, 1), jnp.float32) * 0.1
    ln_b = jax.random.normal(ks[6], (Cb, 1, 1), jnp.float32) * 0.1
    prelu_a = jnp.full((1,), 0.25, jnp.float32)                      # PReLU default init
    w2 = jax.random.normal(ks[7], (C, Cb, 1, 1), jnp.float32) * 0.1  # 1x1 conv Cb->C
    b2 = jax.random.normal(ks[8], (C,), jnp.float32) * 0.1

    out = context_block_2d(x, wm, bm, w1, b1, ln_g, ln_b, prelu_a, w2, b2)
    out = jax.block_until_ready(out)

    ref = _reference(x, wm, bm, w1, b1, ln_g, ln_b, prelu_a, w2, b2)
    assert out.shape == (B, C, H, W)
    assert out.dtype == x.dtype
    assert jnp.allclose(out, ref, atol=1e-4, rtol=1e-4), "mismatch vs reference"

    # TODO(synk): pool='avg' and the 'channel_mul' fusion branch are not
    # instantiated by the module defaults (pool='att', fusions=['channel_add'])
    # and are omitted here.
    print("KERNEL_OK")
</pallas_src>

<mosaic_0001>
module attributes {stable_mosaic.version = 11 : i64} {
  func.func @_context_block_kernel(%arg0: i32, %arg1: memref<1x9x256xf32, #tpu.memory_space<vmem>>, %arg2: memref<13x18xf32, #tpu.memory_space<vmem>>, %arg3: memref<1x9x256xf32, #tpu.memory_space<vmem>>) attributes {dimension_semantics = [#tpu.dimension_semantics<parallel>], iteration_bounds = array<i64: 2>, scalar_prefetch = 0 : i64, scratch_operands = 0 : i64, tpu.core_type = #tpu.core_type<tc>, window_params = [{transform_indices = @transform_0, window_bounds = array<i64: 1, 9, 256>}, {pipeline_mode = #tpu.pipeline_mode<synchronous>, transform_indices = @transform_1, window_bounds = array<i64: 13, 18>}, {transform_indices = @transform_2, window_bounds = array<i64: 1, 9, 256>}]} {
    %c0 = arith.constant 0 : index
    %c0_0 = arith.constant 0 : index
    %c0_1 = arith.constant 0 : index
    %0 = vector.load %arg1[%c0, %c0_0, %c0_1] : memref<1x9x256xf32, #tpu.memory_space<vmem>>, vector<1x9x256xf32>
    %c0_2 = arith.constant 0 : index
    %c0_3 = arith.constant 0 : index
    %1 = vector.load %arg2[%c0_2, %c0_3] : memref<13x18xf32, #tpu.memory_space<vmem>>, vector<13x18xf32>
    %2 = vector.extract_strided_slice %1 {offsets = [0, 0], sizes = [9, 1], strides = [1, 1]} : vector<13x18xf32> to vector<9x1xf32>
    %3 = vector.extract_strided_slice %1 {offsets = [0, 1], sizes = [9, 1], strides = [1, 1]} : vector<13x18xf32> to vector<9x1xf32>
    %4 = vector.extract_strided_slice %1 {offsets = [0, 2], sizes = [9, 8], strides = [1, 1]} : vector<13x18xf32> to vector<9x8xf32>
    %5 = vector.extract_strided_slice %1 {offsets = [0, 10], sizes = [9, 8], strides = [1, 1]} : vector<13x18xf32> to vector<9x8xf32>
    %6 = vector.extract_strided_slice %1 {offsets = [9, 0], sizes = [1, 8], strides = [1, 1]} : vector<13x18xf32> to vector<1x8xf32>
    %7 = vector.extract_strided_slice %1 {offsets = [10, 0], sizes = [1, 8], strides = [1, 1]} : vector<13x18xf32> to vector<1x8xf32>
    %8 = vector.extract_strided_slice %1 {offsets = [11, 0], sizes = [1, 8], strides = [1, 1]} : vector<13x18xf32> to vector<1x8xf32>
    %9 = vector.extract_strided_slice %1 {offsets = [12, 0], sizes = [1, 1], strides = [1, 1]} : vector<13x18xf32> to vector<1x1xf32>
    %10 = vector.shape_cast %2 : vector<9x1xf32> to vector<1x9x1xf32>
    %11 = vector.broadcast %10 : vector<1x9x1xf32> to vector<1x9x256xf32>
    %12 = arith.mulf %0, %11 : vector<1x9x256xf32>
    %cst = arith.constant dense<0.000000e+00> : vector<1x256xf32>
    %13 = vector.multi_reduction <add>, %12, %cst [1] : vector<1x9x256xf32> to vector<1x256xf32>
    %14 = vector.shape_cast %13 : vector<1x256xf32> to vector<1x1x256xf32>
    %cst_4 = arith.constant dense<0xFF800000> : vector<1x1xf32>
    %15 = vector.multi_reduction <maximumf>, %14, %cst_4 [2] : vector<1x1x256xf32> to vector<1x1xf32>
    %16 = vector.shape_cast %15 : vector<1x1xf32> to vector<1x1x1xf32>
    %17 = vector.broadcast %16 : vector<1x1x1xf32> to vector<1x1x256xf32>
    %18 = arith.subf %14, %17 : vector<1x1x256xf32>
    %19 = math.exp %18 : vector<1x1x256xf32>
    %cst_5 = arith.constant dense<0.000000e+00> : vector<1x1xf32>
    %20 = vector.multi_reduction <add>, %19, %cst_5 [2] : vector<1x1x256xf32> to vector<1x1xf32>
    %21 = vector.shape_cast %20 : vector<1x1xf32> to vector<1x1x1xf32>
    %22 = vector.broadcast %19 : vector<1x1x256xf32> to vector<1x9x256xf32>
    %23 = arith.mulf %0, %22 : vector<1x9x256xf32>
    %cst_6 = arith.constant dense<0.000000e+00> : vector<1x9xf32>
    %24 = vector.multi_reduction <add>, %23, %cst_6 [2] : vector<1x9x256xf32> to vector<1x9xf32>
    %25 = vector.shape_cast %24 : vector<1x9xf32> to vector<1x9x1xf32>
    %26 = vector.broadcast %21 : vector<1x1x1xf32> to vector<1x9x1xf32>
    %27 = arith.divf %25, %26 : vector<1x9x1xf32>
    %28 = vector.shape_cast %4 : vector<9x8xf32> to vector<1x9x8xf32>
    %29 = vector.broadcast %27 : vector<1x9x1xf32> to vector<1x9x8xf32>
    %30 = arith.mulf %28, %29 : vector<1x9x8xf32>
    %cst_7 = arith.constant dense<0.000000e+00> : vector<1x8xf32>
    %31 = vector.multi_reduction <add>, %30, %cst_7 [1] : vector<1x9x8xf32> to vector<1x8xf32>
    %32 = vector.shape_cast %31 : vector<1x8xf32> to vector<1x1x8xf32>
    %33 = vector.shape_cast %6 : vector<1x8xf32> to vector<1x1x8xf32>
    %34 = arith.addf %32, %33 : vector<1x1x8xf32>
    %cst_8 = arith.constant dense<0.000000e+00> : vector<1x1xf32>
    %35 = vector.multi_reduction <add>, %34, %cst_8 [2] : vector<1x1x8xf32> to vector<1x1xf32>
    %36 = vector.shape_cast %35 : vector<1x1xf32> to vector<1x1x1xf32>
    %cst_9 = arith.constant 8.000000e+00 : f32
    %37 = vector.broadcast %cst_9 : f32 to vector<1x1x1xf32>
    %38 = arith.divf %36, %37 : vector<1x1x1xf32>
    %39 = vector.broadcast %38 : vector<1x1x1xf32> to vector<1x1x8xf32>
    %40 = arith.subf %34, %39 : vector<1x1x8xf32>
    %41 = vector.broadcast %38 : vector<1x1x1xf32> to vector<1x1x8xf32>
    %42 = arith.subf %34, %41 : vector<1x1x8xf32>
    %43 = arith.mulf %40, %42 : vector<1x1x8xf32>
    %cst_10 = arith.constant dense<0.000000e+00> : vector<1x1xf32>
    %44 = vector.multi_reduction <add>, %43, %cst_10 [2] : vector<1x1x8xf32> to vector<1x1xf32>
    %45 = vector.shape_cast %44 : vector<1x1xf32> to vector<1x1x1xf32>
    %cst_11 = arith.constant 8.000000e+00 : f32
    %46 = vector.broadcast %cst_11 : f32 to vector<1x1x1xf32>
    %47 = arith.divf %45, %46 : vector<1x1x1xf32>
    %48 = vector.broadcast %38 : vector<1x1x1xf32> to vector<1x1x8xf32>
    %49 = arith.subf %34, %48 : vector<1x1x8xf32>
    %cst_12 = arith.constant 9.99999974E-6 : f32
    %50 = vector.broadcast %cst_12 : f32 to vector<1x1x1xf32>
    %51 = arith.addf %47, %50 : vector<1x1x1xf32>
    %52 = math.rsqrt %51 : vector<1x1x1xf32>
    %53 = vector.broadcast %52 : vector<1x1x1xf32> to vector<1x1x8xf32>
    %54 = arith.mulf %49, %53 : vector<1x1x8xf32>
    %55 = vector.shape_cast %7 : vector<1x8xf32> to vector<1x1x8xf32>
    %56 = arith.mulf %54, %55 : vector<1x1x8xf32>
    %57 = vector.shape_cast %8 : vector<1x8xf32> to vector<1x1x8xf32>
    %58 = arith.addf %56, %57 : vector<1x1x8xf32>
    %cst_13 = arith.constant 0.000000e+00 : f32
    %59 = vector.broadcast %cst_13 : f32 to vector<1x1x8xf32>
    %60 = arith.maximumf %58, %59 : vector<1x1x8xf32>
    %61 = vector.shape_cast %9 : vector<1x1xf32> to vector<1x1x1xf32>
    %cst_14 = arith.constant 0.000000e+00 : f32
    %62 = vector.broadcast %cst_14 : f32 to vector<1x1x8xf32>
    %63 = arith.minimumf %58, %62 : vector<1x1x8xf32>
    %64 = vector.broadcast %61 : vector<1x1x1xf32> to vector<1x1x8xf32>
    %65 = arith.mulf %64, %63 : vector<1x1x8xf32>
    %66 = arith.addf %60, %65 : vector<1x1x8xf32>
    %67 = vector.shape_cast %5 : vector<9x8xf32> to vector<1x9x8xf32>
    %68 = vector.broadcast %66 : vector<1x1x8xf32> to vector<1x9x8xf32>
    %69 = arith.mulf %67, %68 : vector<1x9x8xf32>
    %cst_15 = arith.constant dense<0.000000e+00> : vector<1x9xf32>
    %70 = vector.multi_reduction <add>, %69, %cst_15 [2] : vector<1x9x8xf32> to vector<1x9xf32>
    %71 = vector.shape_cast %70 : vector<1x9xf32> to vector<1x9x1xf32>
    %72 = vector.shape_cast %3 : vector<9x1xf32> to vector<1x9x1xf32>
    %73 = arith.addf %71, %72 : vector<1x9x1xf32>
    %74 = vector.broadcast %73 : vector<1x9x1xf32> to vector<1x9x256xf32>
    %75 = arith.addf %0, %74 : vector<1x9x256xf32>
    %c0_16 = arith.constant 0 : index
    %c0_17 = arith.constant 0 : index
    %c0_18 = arith.constant 0 : index
    %76 = vector.load %arg3[%c0_16, %c0_17, %c0_18] : memref<1x9x256xf32, #tpu.memory_space<vmem>>, vector<1x9x256xf32>
    tpu.vector_store %arg3[%c0_16, %c0_17, %c0_18], %75 {strides = array<i32>} : memref<1x9x256xf32, #tpu.memory_space<vmem>>, vector<1x9x256xf32>,
    return
  }
  func.func @transform_0(%arg0: i32) -> (i32, i32, i32) {
    %c0_i32 = arith.constant 0 : i32
    %c0_i32_0 = arith.constant 0 : i32
    %c0_i32_1 = arith.constant 0 : i32
    return %arg0, %c0_i32, %c0_i32_0 : i32, i32, i32
  }
  func.func @transform_1(%arg0: i32) -> (i32, i32) {
    %c0_i32 = arith.constant 0 : i32
    %c0_i32_0 = arith.constant 0 : i32
    %c0_i32_1 = arith.constant 0 : i32
    return %c0_i32, %c0_i32_0 : i32, i32
  }
  func.func @transform_2(%arg0: i32) -> (i32, i32, i32) {
    %c0_i32 = arith.constant 0 : i32
    %c0_i32_0 = arith.constant 0 : i32
    %c0_i32_1 = arith.constant 0 : i32
    return %arg0, %c0_i32, %c0_i32_0 : i32, i32, i32
  }
}

</mosaic_0001>

<bundles_post_ra>
// kernel: tpu_custom_call.1
= control target key start
LH: loop header
LB: loop body
LE: loop exit
PB: predicated region body
PF: predicated region fallthrough
CT: control target
= control target key end

     0   :  { %s468_s9 = smov 0   ;;  %s552_s0 = inlined_call_operand.vmem [shape: f32[2,9,256], index: 0, kind: input, shape index: {}]   ;;  %s553_s1 = inlined_call_operand.vmem [shape: f32[13,18], index: 1, kind: input, shape index: {}]   ;;  %s554_s2 = inlined_call_operand.vmem [shape: f32[2,9,256], index: 2, kind: output, shape index: {}]  }
   0x1 LB: > { %s398_s10 = sadd.s32 4294967295, %s444_s9   ;;  %p402_p0 = scmp.ge.s32.totalorder %s444_s9, 1  ;;  %s444_s9 = sphi %s468_s9, %s12_s9  }
   0x2   : > { %p112_p1 = scmp.lt.s32.totalorder %s444_s9, 3 }
   0x4   : > { %p113_p2 = pnand %p402_p0, %p112_p1 }
   0x5   : > { %p134_p3 = scmp.lt.s32.totalorder (!%p113_p2), %s398_s10, 1  ;;  %s447_s19 = smov (!%p113_p2), 2  }
   0x6   : > { %116 = sbr.rel (%p113_p2) target bundleno = 1656 (0x678), region = 28  ;;  %s448_s20 = smov (!%p113_p2), 126  }
   0x7   : > { %s450_s21 = smov (!%p113_p2), 8   ;;  %s451_s22 = smov (!%p113_p2), 118  }
   0xb   : > { %v479_v0 = vld [vmem:[%s553_s1 + $0x8] sm:$0x1f]  ;;  %v446_v1 = vmov 0   ;;  %v485_v2 = vld [vmem:[%s553_s1] sm:$0xff]  ;;  %s556_s10 = smov (!%p134_p3, %s398_s10), 1  ;;  %vm164_vm0 = vcmask 1040384  }
   0xc   : > { %426 = vset.pattern.permute.xlu0 %v446_v1  ;;  %s409_s15 = sshll.u32 %s556_s10, 5  ;;  %v234_v30 = vrot.slane %v479_v0, 1  ;;  %vm223_vm5 = vcmask 80912   ;;  %vm225_vm6 = vcmask 73744   ;;  %vm243_vm7 = vcmask 57344  }
   0xd   : > { %157 = vperm.xlu0 %426, %v479_v0   ;;  %s138_s18 = scalar_lea.vmem %s552_s0, %s409_s15  ;;  %vm316_vm12 = vcmask 64512   ;;  %s143_s25 = scalar_lea.vmem %s554_s2, %s409_s15 }
   0xe   : > { %v498_v4 = vld [vmem:[%s138_s18 + $0x10] sm:$0x1]  ;;  %v500_v5 = vld [vmem:[%s138_s18 + $0x18] sm:$0x1]  ;;  %v506_v8 = vld [vmem:[%s138_s18] sm:$0xff] }
   0xf   : > { %v508_v9 = vld [vmem:[%s138_s18 + $0x8] sm:$0xff] }
  0x15   : > { %152 = vperm.xlu0 %426, %v485_v2  }
  0x1d   : > { %235 = vrot.lane.b32.xlu0 %v234_v30, %s447_s19 }
  0x7f   : > { %v491_v3 = vpop.permute.xlu0 %157 }
  0x80   : > { %v162_v6 = vmul.f32 %v491_v3, %v498_v4  ;;  %v163_v7 = vmul.f32 %v491_v3, %v500_v5 }
  0x82   : > { %v165_v13 = vsel %vm164_vm0, %v162_v6, 0.0  ;;  %v173_v14 = vsel %vm164_vm0, %v163_v7, 0.0 }
  0x87   : > { %v153_v10 = vpop.permute.xlu0 %152 }
  0x88   : > { %v160_v11 = vmul.f32 %v153_v10, %v506_v8  ;;  %v161_v12 = vmul.f32 %v153_v10, %v508_v9 }
  0x8a   : > { %v166_v15 = vadd.f32 %v165_v13, %v160_v11  ;;  %v174_v16 = vadd.f32 %v173_v14, %v161_v12 }
  0x8c   : > { %v167_v17 = vrot.slane %v166_v15, 4  ;;  %v175_v18 = vrot.slane %v174_v16, 4 }
  0x8e   : > { %v168_v19 = vadd.f32 %v167_v17, %v166_v15  ;;  %v176_v20 = vadd.f32 %v175_v18, %v174_v16 }
  0x8f   : > { %v236_v15 = vpop.permute.xlu0 %235 }
  0x90   : > { %v169_v21 = vrot.slane %v168_v19, 2  ;;  %v177_v22 = vrot.slane %v176_v20, 2 }
  0x92   : > { %v170_v23 = vadd.f32 %v169_v21, %v168_v19  ;;  %v178_v24 = vadd.f32 %v177_v22, %v176_v20  ;;  %v449_v20 = vmov 8.0  }
  0x94   : > { %v171_v25 = vrot.slane %v170_v23, 1  ;;  %v179_v26 = vrot.slane %v178_v24, 1 }
  0x96   : > { %v172_v27 = vadd.f32 %v171_v25, %v170_v23  ;;  %v180_v28 = vadd.f32 %v179_v26, %v178_v24 }
  0x98   : > { %v181_v29 = vmax.f32 %v172_v27, %v180_v28 }
  0x9a   : > { %182 = vmax.xlane.f32.xlu1 %v181_v29 }
 0x10d   : > { %v183_v31 = vpop.xlane.xlu1 %182 }
 0x10e   : > { %v184_v32 = vsub.f32 %v172_v27, %v183_v31  ;;  %v185_v33 = vsub.f32 %v180_v28, %v183_v31  ;;  %v277_v31 = vrot.slane %v479_v0, 2 }
 0x110   : > { %v186_v34 = vmul.f32 1.442695, %v184_v32  ;;  %v188_v35 = vmul.f32 1.442695, %v185_v33 }
 0x112   : > { %428 = vpow2.f32 %v186_v34  ;;  %v282_v34 = vrot.slane %v479_v0, 3 }
 0x113   : > { %430 = vpow2.f32 %v188_v35 }
 0x118   : > { %v429_v36 = vpop.eup %428 }
 0x119   : > { %v431_v37 = vpop.eup %430  ;;  %v193_v38 = vmul.f32 %v429_v36, %v506_v8  ;;  %v195_v42 = vmul.f32 %v429_v36, %v498_v4 }
 0x11a   : > { %v190_v39 = vadd.f32 %v431_v37, %v429_v36  ;;  %v194_v40 = vmul.f32 %v431_v37, %v508_v9  ;;  %v196_v43 = vmul.f32 %v431_v37, %v500_v5 }
 0x11b   : > { %v200_v44 = vsel %vm164_vm0, %v195_v42, 0.0 }
 0x11c   : > { %191 = vadd.xlane.f32.xlu1 %v190_v39  ;;  %v197_v41 = vadd.f32 %v194_v40, %v193_v38  ;;  %v201_v45 = vsel %vm164_vm0, %v196_v43, 0.0 }
 0x11d   : > { %v202_v46 = vadd.f32 %v201_v45, %v200_v44 }
 0x11e   : > { %198 = vadd.xlane.f32.xlu2 %v197_v41 }
 0x126   : > { %203 = vadd.xlane.f32.xlu2 %v202_v46 }
 0x18f   : > { %v192_v47 = vpop.xlane.xlu1 %191 }
 0x190   : > { %432 = vrcp.f32 %v192_v47  ;;  %v216_v52 = vand.u32 2147483648, %v192_v47  ;;  %v214_v54 = vand.u32 2147483647, %v192_v47  ;;  %vm210_vm2 = vweird.f32 %v192_v47 }
 0x191   : > { %v199_v49 = vpop.xlane.xlu2 %198  ;;  %434 = vrcp.f32 %v449_v20 }
 0x192   : > { %v217_v56 = vor.u32 1.1754944e-38, %v216_v52  ;;  %vm215_vm4 = vcmp.eq.f32.partialorder %v214_v54, 8.507059e+37 }
 0x196   : > { %v433_v48 = vpop.eup %432 }
 0x197   : > { %v206_v50 = vmul.f32 %v433_v48, %v192_v47  ;;  %vm211_vm1 = vweird.f32 %v433_v48  ;;  %v435_v21 = vpop.eup %434 }
 0x198   : > { %vm212_vm3 = vmor %vm210_vm2, %vm211_vm1  ;;  %v248_v22 = vmul.f32 8.0, %v435_v21  ;;  %vm252_vm8 = vweird.f32 %v435_v21 }
 0x199   : > { %v207_v51 = vsub.f32 1.0, %v206_v50  ;;  %v204_v59 = vpop.xlane.xlu2 %203 }
 0x19a   : > { %v249_v23 = vsub.f32 1.0, %v248_v22 }
 0x19b   : > { %v208_v53 = vmul.f32 %v433_v48, %v207_v51 }
 0x19c   : > { %v250_v24 = vmul.f32 %v435_v21, %v249_v23 }
 0x19d   : > { %v209_v55 = vadd.f32 %v433_v48, %v208_v53 }
 0x19e   : > { %v251_v25 = vadd.f32 %v435_v21, %v250_v24 }
 0x19f   : > { %v213_v57 = vsel %vm212_vm3, %v433_v48, %v209_v55 }
 0x1a0   : > { %v218_v58 = vsel %vm215_vm4, %v217_v56, %v213_v57  ;;  %v253_v26 = vsel %vm252_vm8, %v435_v21, %v251_v25 }
 0x1a1   : > { %v219_v60 = vmul.f32 %v218_v58, %v199_v49  ;;  %v220_v61 = vmul.f32 %v218_v58, %v204_v59 }
 0x1a3   : > { %v221_v62 = vmul.f32 %v219_v60, %v485_v2  ;;  %v222_v63 = vmul.f32 %v220_v61, %v479_v0 }
 0x1a5   : > { %v224_v1 = vsel %vm223_vm5, %v221_v62, 0.0  ;;  %v226_v6 = vsel %vm225_vm6, %v222_v63, 0.0 }
 0x1a6   : > { %v227_v7 = vadd.f32 %v226_v6, %v224_v1  ;;  %v452_v6 = vmov 1  }
 0x1a7   : > { %427 = vset.pattern.permute.xlu0 %v452_v6 }
 0x1a8   : > { %v228_v10 = vrot.slane %v227_v7, 4 }
 0x1aa   : > { %v229_v11 = vadd.f32 %v228_v10, %v227_v7 }
 0x1ac   : > { %v230_v12 = vrot.slane %v229_v11, 2 }
 0x1ae   : > { %v231_v13 = vadd.f32 %v230_v12, %v229_v11 }
 0x1b0   : > { %v232_v14 = vrot.slane %v231_v13, 1 }
 0x1b2   : > { %v233_v16 = vadd.f32 %v232_v14, %v231_v13 }
 0x1b4   : > { %v238_v17 = vadd.f32 %v236_v15, %v233_v16 }
 0x1b6   : > { %240 = vrot.lane.b32.xlu1 %v238_v17, %s448_s20 }
 0x228   : > { %v241_v18 = vpop.permute.xlu1 %240 }
 0x229   : > { %v244_v19 = vsel %vm243_vm7, %v241_v18, 0.0 }
 0x22a   : > { %245 = vadd.xlane.f32.xlu2 %v244_v19 }
 0x29d   : > { %v246_v27 = vpop.xlane.xlu2 %245 }
 0x29e   : > { %v254_v28 = vmul.f32 %v253_v26, %v246_v27 }
 0x2a0   : > { %v255_v29 = vsub.f32 %v238_v17, %v254_v28 }
 0x2a2   : > { %v256_v30 = vmul.f32 %v255_v29, %v255_v29 }
 0x2a4   : > { %258 = vrot.lane.b32.xlu0 %v256_v30, %s448_s20 }
 0x2ac   : > { %278 = vrot.lane.b32.xlu0 %v277_v31, %s447_s19 }
 0x316   : > { %v259_v32 = vpop.permute.xlu0 %258 }
 0x317   : > { %v261_v33 = vsel %vm243_vm7, %v259_v32, 0.0 }
 0x318   : > { %262 = vadd.xlane.f32.xlu2 %v261_v33 }
 0x31e   : > { %v279_v45 = vpop.permute.xlu0 %278 }
 0x330   : > { %283 = vrot.lane.b32.xlu2 %v282_v34, %s447_s19 }
 0x38b   : > { %v263_v35 = vpop.xlane.xlu2 %262 }
 0x38c   : > { %v264_v36 = vmul.f32 %v263_v35, %v253_v26 }
 0x38e   : > { %v265_v37 = vadd.f32 1e-05, %v264_v36 }
 0x390   : > { %436 = vrsqrt.f32 %v265_v37  ;;  %vm272_vm10 = vweird.f32 %v265_v37 }
 0x393   : > { %v284_v47 = vpop.permute.xlu2 %283 }
 0x396   : > { %v437_v38 = vpop.eup %436 }
 0x397   : > { %v267_v39 = vmul.f32 %v437_v38, %v265_v37  ;;  %vm273_vm9 = vweird.f32 %v437_v38 }
 0x398   : > { %vm274_vm11 = vmor %vm272_vm10, %vm273_vm9 }
 0x399   : > { %v268_v40 = vmul.f32 %v437_v38, %v267_v39 }
 0x39b   : > { %v269_v41 = vmul.f32 0.5, %v268_v40 }
 0x39d   : > { %v270_v42 = vsub.f32 1.5, %v269_v41 }
 0x39f   : > { %v271_v43 = vmul.f32 %v437_v38, %v270_v42 }
 0x3a1   : > { %v275_v44 = vsel %vm274_vm11, %v437_v38, %v271_v43 }
 0x3a2   : > { %v276_v46 = vmul.f32 %v275_v44, %v255_v29 }
 0x3a4   : > { %v281_v48 = vmul.f32 %v279_v45, %v276_v46 }
 0x3a6   : > { %v286_v49 = vadd.f32 %v284_v47, %v281_v48 }
 0x3a8   : > { %v288_v50 = vmin.f32 %v286_v49, 0.0  ;;  %v287_v55 = vmax.f32 %v286_v49, 0.0 }
 0x3aa   : > { %v290_v51 = vrot.slane %v288_v50, 4 }
 0x3ac   : > { %291 = vrot.lane.b32.xlu0 %v290_v51, %s448_s20 }
 0x41e   : > { %v292_v52 = vpop.permute.xlu0 %291 }
 0x41f   : > { %v294_v53 = vmul.f32 %v292_v52, %v491_v3 }
 0x421   : > { %v296_v54 = vrot.slane %v294_v53, 4 }
 0x423   : > { %297 = vrot.lane.b32.xlu1 %v296_v54, %s447_s19 }
 0x495   : > { %v298_v56 = vpop.permute.xlu1 %297 }
 0x496   : > { %v300_v57 = vadd.f32 %v298_v56, %v287_v55 }
 0x498   : > { %v301_v58 = vperm.slane %v300_v57, 0 }
 0x49a   : > { %303 = vrot.lane.b32.xlu0 %v301_v58, %s450_s21 }
 0x50c   : > { %v304_v59 = vpop.permute.xlu0 %303 }
 0x50d   : > { %v306_v60 = vmul.f32 %v304_v59, %v485_v2  ;;  %v307_v61 = vmul.f32 %v304_v59, %v479_v0 }
 0x50f   : > { %312 = vrot.lane.b32.xlu0 %v307_v61, %s451_s22  ;;  %310 = vrot.lane.b32.xlu1 %v306_v60, %s451_s22 }
 0x581   : > { %v313_v3 = vpop.permute.xlu0 %312  ;;  %v311_v62 = vpop.permute.xlu1 %310 }
 0x582   : > { %v320_v63 = vsel %vm243_vm7, %v313_v3, 0.0  ;;  %v317_v1 = vsel %vm316_vm12, %v311_v62, 0.0 }
 0x583   : > { %321 = vadd.xlane.f32.xlu1 %v320_v63  ;;  %318 = vadd.xlane.f32.xlu2 %v317_v1 }
 0x5f6   : > { %v319_v7 = vpop.xlane.xlu2 %318  ;;  %v322_v11 = vpop.xlane.xlu1 %321 }
 0x5f7   : > { %v323_v10 = vadd.f32 %v319_v7, %v485_v2  ;;  %v324_v12 = vadd.f32 %v322_v11, %v479_v0 }
 0x5f9   : > { %327 = vperm.xlu0 %427, %v323_v10  }
 0x601   : > { %332 = vperm.xlu0 %427, %v324_v12  }
 0x66b   : > { %v328_v13 = vpop.permute.xlu0 %327 }
 0x66c   : > { %v335_v14 = vadd.f32 %v328_v13, %v506_v8  ;;  %v336_v15 = vadd.f32 %v328_v13, %v508_v9 }
 0x66e   : > { %339 = vst [vmem:[%s143_s25] sm:$0xff] %v335_v14 }
 0x66f   : > { %340 = vst [vmem:[%s143_s25 + $0x8] sm:$0xff] %v336_v15 }
 0x673   : > { %v333_v16 = vpop.permute.xlu0 %332 }
 0x674   : > { %v337_v2 = vadd.f32 %v333_v16, %v498_v4  ;;  %v338_v17 = vadd.f32 %v333_v16, %v500_v5 }
 0x676   : > { %341 = vst [vmem:[%s143_s25 + $0x10] sm:$0x1] %v337_v2 }
 0x677   : > { %342 = vst [vmem:[%s143_s25 + $0x18] sm:$0x1] %v338_v17 }
 0x678 PF: > { %s12_s9 = sadd.s32 1, %s444_s9  }
 0x679   : > { %p9_p4 = scmp.ge.s32.totalorder %s12_s9, 4  }
 0x67b   :  { %11 = sbr.rel (!%p9_p4) target bundleno = 1 (0x1), region = 58 }

</bundles_post_ra>
